<compile_context>
chip_gen: v5e
topology: v5e:2x2
jax: 0.10.0
libtpu: 0.0.40
codegen_flags: <defaults>
</compile_context>

<pallas_src>
import functools

import numpy as np
import jax
import jax.numpy as jnp
from jax.experimental import pallas as pl
from jax.experimental.pallas import tpu as pltpu

VMEM_LIMIT_BYTES = 32 * 1024 * 1024  # <= physical VMEM on every generation


# ----------------------------------------------------------------------------
# Host-side construction of pooling / interpolation matrices.
# ----------------------------------------------------------------------------
def adaptive_pool_matrix(out_size, in_size):
    """Row i averages input indices [floor(i*in/out), ceil((i+1)*in/out))."""
    m = np.zeros((out_size, in_size), np.float32)
    for i in range(out_size):
        start = (i * in_size) // out_size
        end = -((-(i + 1) * in_size) // out_size)  # ceil((i+1)*in/out)
        m[i, start:end] = 1.0 / (end - start)
    return m


def bilinear_matrix(out_size, in_size):
    """F.interpolate(..., mode='bilinear', align_corners=True) as (out,in)."""
    m = np.zeros((out_size, in_size), np.float32)
    if in_size == 1:
        m[:, 0] = 1.0
        return m
    for o in range(out_size):
        src = 0.0 if out_size == 1 else o * (in_size - 1) / (out_size - 1)
        i0 = int(np.floor(src))
        i1 = min(i0 + 1, in_size - 1)
        f = src - i0
        m[o, i0] += 1.0 - f
        m[o, i1] += f
    return m


def _round_up(x, m):
    return ((x + m - 1) // m) * m


def _row_tile(rows, max_tile, itemsize):
    """Largest sublane-aligned divisor of `rows` that is <= max_tile (or the
    largest divisor / rows itself as fallbacks)."""
    align = {4: 8, 2: 16, 1: 32}.get(int(itemsize), 8)
    max_tile = max(1, min(rows, int(max_tile)))
    fallback = None
    for t in range(max_tile, 0, -1):
        if rows % t:
            continue
        if t % align == 0 or t == rows:
            return t
        if fallback is None:
            fallback = t
    return fallback if fallback is not None else rows


def _cin_tile(cin, max_tile=512):
    """Cin tile for the conv kernel: full Cin if small, else a 128-multiple
    divisor (keeps the (Cout, cin_tile) weight block lane-dense)."""
    if cin <= max_tile:
        return cin
    for t in range(max_tile - (max_tile % 128), 0, -128):
        if t > 0 and cin % t == 0:
            return t
    return cin


# ----------------------------------------------------------------------------
# Kernel 1: adaptive average pooling as one lane-dense matmul per row tile.
# ----------------------------------------------------------------------------
def _pool_kernel(x_ref, pt_ref, pooled_ref, *, cdt):
    # In-kernel cast of the streamed operand (no wrapper-side astype pass).
    pooled_ref[...] = jnp.dot(
        x_ref[...].astype(cdt), pt_ref[...],
        preferred_element_type=jnp.float32).astype(pooled_ref.dtype)


# ----------------------------------------------------------------------------
# Kernel 2 (tiny): 1x1 conv accumulated over Cin tiles, then BN (batch stats,
# centered two-pass variance) + ReLU in the finalize.
# ----------------------------------------------------------------------------
def _conv_bn_relu_kernel(pooled_ref, w_ref, gamma_ref, beta_ref, y_ref,
                         acc_ref, *, n, cout, s, eps):
    k = pl.program_id(0)

    @pl.when(k == 0)
    def _():
        acc_ref[...] = jnp.zeros_like(acc_ref)

    # Partial 1x1 conv for this Cin slice: (Cout, ct) x (N, ct, S) -> (N, Cout, S)
    acc_ref[...] += jnp.einsum('oc,ncs->nos', w_ref[...], pooled_ref[...],
                               preferred_element_type=jnp.float32)

    @pl.when(k == pl.num_programs(0) - 1)
    def _():
        y = acc_ref[...]                                   # (N, Cout, S) f32
        cnt = float(n * s)
        mean = jnp.sum(y, axis=(0, 2), keepdims=True) / cnt
        yc = y - mean
        var = jnp.sum(yc * yc, axis=(0, 2), keepdims=True) / cnt  # biased
        g = gamma_ref[...][None]                           # (1, Cout, 1)
        b = beta_ref[...][None]
        out = jnp.maximum(yc * jax.lax.rsqrt(var + eps) * g + b, 0.0)
        y_ref[...] = out.reshape(n * cout, s).astype(y_ref.dtype)


# ----------------------------------------------------------------------------
# Kernel 3: bilinear (align_corners=True) upsample as one lane-dense matmul.
# ----------------------------------------------------------------------------
def _upsample_kernel(y_ref, ut_ref, o_ref, *, cdt):
    o_ref[...] = jnp.dot(y_ref[...].astype(cdt), ut_ref[...],
                         preferred_element_type=jnp.float32).astype(o_ref.dtype)


# ----------------------------------------------------------------------------
# Wrapper
# ----------------------------------------------------------------------------
def psp_module_pallas(x, conv_w, gamma, beta, pt, ut, bins, *,
                      compute_dtype=jnp.float32, out_dtype=None,
                      stream_tile_bytes=4 << 20, max_rows_per_tile=None):
    n, cin, h, w = x.shape
    cout = conv_w.shape[0]
    s = bins * bins
    hw = h * w
    assert pt.shape == (hw, s) and ut.shape == (s, hw)

    cdt = jnp.dtype(compute_dtype)
    odt = jnp.dtype(out_dtype) if out_dtype is not None else jnp.dtype(x.dtype)

    # Lane-dense 2D views.  NO dtype cast of X here (done in-kernel instead).
    hw_pad = _round_up(hw, 128)
    x2d = x.reshape(n * cin, hw)
    pt_c = pt.astype(cdt)                       # tiny matrices: host-side cast OK
    ut_c = ut.astype(cdt)
    if hw_pad != hw:
        x2d = jnp.pad(x2d, ((0, 0), (0, hw_pad - hw)))
        pt_c = jnp.pad(pt_c, ((0, hw_pad - hw), (0, 0)))
        ut_c = jnp.pad(ut_c, ((0, 0), (0, hw_pad - hw)))

    w_f = conv_w.astype(jnp.float32)
    gamma_f = jnp.asarray(gamma, jnp.float32).reshape(cout, 1)
    beta_f = jnp.asarray(beta, jnp.float32).reshape(cout, 1)

    # ---- kernel 1: adaptive average pooling ("parallel" streaming axis) ----
    rows = n * cin
    x_item = jnp.dtype(x.dtype).itemsize
    max_xt = max(1, stream_tile_bytes // (hw_pad * x_item))
    if max_rows_per_tile is not None:
        max_xt = min(max_xt, max_rows_per_tile)
    x_tile = _row_tile(rows, max_xt, min(x_item, 4))

    pooled = pl.pallas_call(
        functools.partial(_pool_kernel, cdt=cdt),
        out_shape=jax.ShapeDtypeStruct((rows, s), jnp.float32),
        grid=(rows // x_tile,),
        in_specs=[
            pl.BlockSpec((x_tile, hw_pad), lambda i: (i, 0)),   # streamed X tiles
            pl.BlockSpec((hw_pad, s), lambda i: (0, 0)),        # pooling matrix
        ],
        out_specs=pl.BlockSpec((x_tile, s), lambda i: (i, 0)),
        compiler_params=pltpu.CompilerParams(
            dimension_semantics=("parallel",),
            vmem_limit_bytes=VMEM_LIMIT_BYTES),
    )(x2d, pt_c)

    # ---- kernel 2: tiny 1x1 conv (+ BN + ReLU) over Cin tiles --------------
    pooled3 = pooled.reshape(n, cin, s)
    ct = _cin_tile(cin)
    y2d = pl.pallas_call(
        functools.partial(_conv_bn_relu_kernel, n=n, cout=cout, s=s, eps=1e-5),
        out_shape=jax.ShapeDtypeStruct((n * cout, s), jnp.float32),
        grid=(cin // ct,),
        in_specs=[
            pl.BlockSpec((n, ct, s), lambda k: (0, k, 0)),      # pooled slice
            pl.BlockSpec((cout, ct), lambda k: (0, k)),         # conv weight slice
            pl.BlockSpec((cout, 1), lambda k: (0, 0)),          # BN gamma
            pl.BlockSpec((cout, 1), lambda k: (0, 0)),          # BN beta
        ],
        out_specs=pl.BlockSpec((n * cout, s), lambda k: (0, 0)),
        scratch_shapes=[pltpu.VMEM((n, cout, s), jnp.float32)],
        compiler_params=pltpu.CompilerParams(
            dimension_semantics=("arbitrary",)),
    )(pooled3, w_f, gamma_f, beta_f)

    # ---- kernel 3: bilinear upsample ("parallel", out dtype parameterized) -
    orows = n * cout
    o_item = odt.itemsize
    max_ot = max(1, stream_tile_bytes // (hw_pad * o_item + 512))
    if max_rows_per_tile is not None:
        max_ot = min(max_ot, max_rows_per_tile)
    o_tile = _row_tile(orows, max_ot, min(4, o_item))

    out2d = pl.pallas_call(
        functools.partial(_upsample_kernel, cdt=cdt),
        out_shape=jax.ShapeDtypeStruct((orows, hw_pad), odt),
        grid=(orows // o_tile,),
        in_specs=[
            pl.BlockSpec((o_tile, s), lambda j: (j, 0)),
            pl.BlockSpec((s, hw_pad), lambda j: (0, 0)),
        ],
        out_specs=pl.BlockSpec((o_tile, hw_pad), lambda j: (j, 0)),
        compiler_params=pltpu.CompilerParams(
            dimension_semantics=("parallel",),
            vmem_limit_bytes=VMEM_LIMIT_BYTES),
    )(y2d, ut_c)

    if hw_pad != hw:
        out2d = out2d[:, :hw]
    return out2d.reshape(n, cout, h, w)


# ----------------------------------------------------------------------------
# Pure-JAX reference (pool via reshape-mean since bins divides H, W here).
# ----------------------------------------------------------------------------
def psp_module_reference(x, conv_w, gamma, beta, uh, uwt, bins):
    n, cin, h, w = x.shape
    pooled = x.reshape(n, cin, bins, h // bins, bins, w // bins).mean(axis=(3, 5))
    y = jnp.einsum('oc,ncij->noij', conv_w, pooled)
    mean = y.mean(axis=(0, 2, 3), keepdims=True)
    var = ((y - mean) ** 2).mean(axis=(0, 2, 3), keepdims=True)
    y = (y - mean) * jax.lax.rsqrt(var + 1e-5)
    y = y * gamma.reshape(1, -1, 1, 1) + beta.reshape(1, -1, 1, 1)
    y = jnp.maximum(y, 0.0)
    z = jnp.einsum('hi,noij->nohj', uh, y)
    return jnp.einsum('jw,nohj->nohw', uwt, z)


if __name__ == "__main__":
    # Small shapes consistent with the module: in_channels=4, out_channels=8, bin=4.
    N, Cin, Cout, BIN, H, W = 2, 4, 8, 4, 16, 16

    key = jax.random.PRNGKey(0)
    k1, k2, k3, k4 = jax.random.split(key, 4)
    x = jax.random.normal(k1, (N, Cin, H, W), jnp.float32)
    conv_w = 0.1 * jax.random.normal(k2, (Cout, Cin), jnp.float32)   # Conv2d(1x1, bias=False)
    gamma = 1.0 + 0.1 * jax.random.normal(k3, (Cout,), jnp.float32)  # BN weight
    beta = 0.1 * jax.random.normal(k4, (Cout,), jnp.float32)         # BN bias

    # Separable pool / bilinear matrices folded into Kronecker form.
    ah = adaptive_pool_matrix(BIN, H)            # (BIN, H)
    aw = adaptive_pool_matrix(BIN, W)            # (BIN, W)
    uh = bilinear_matrix(H, BIN)                 # (H, BIN)
    uw = bilinear_matrix(W, BIN)                 # (W, BIN)
    pt = jnp.asarray(np.kron(ah, aw).T)          # (H*W, BIN*BIN): pooled2d = X2d @ pt
    ut = jnp.asarray(np.kron(uh, uw).T)          # (BIN*BIN, H*W): out2d = Y2d @ ut

    ref = psp_module_reference(x, conv_w, gamma, beta,
                               jnp.asarray(uh), jnp.asarray(uw.T), BIN)

    # f32 path (tight tolerance); small row cap to exercise a >1 grid on the
    # upsample kernel.
    out = psp_module_pallas(x, conv_w, gamma, beta, pt, ut, BIN,
                            compute_dtype=jnp.float32, out_dtype=jnp.float32,
                            max_rows_per_tile=8)
    out = jax.block_until_ready(out)
    assert out.shape == (N, Cout, H, W)
    assert bool(jnp.allclose(out, ref, atol=1e-4, rtol=1e-4)), \
        "f32 mismatch vs JAX reference"

    # bf16 MXU operands + bf16 output storage (halves the dominant HBM write);
    # accumulation and BN/ReLU math stay in f32.
    out_bf16 = psp_module_pallas(x, conv_w, gamma, beta, pt, ut, BIN,
                                 compute_dtype=jnp.bfloat16,
                                 out_dtype=jnp.bfloat16)
    out_bf16 = jax.block_until_ready(out_bf16)
    assert out_bf16.dtype == jnp.bfloat16
    assert bool(jnp.allclose(out_bf16.astype(jnp.float32), ref,
                             atol=1e-1, rtol=1e-1)), \
        "bf16 mismatch vs JAX reference"

    print("KERNEL_OK")
</pallas_src>

<mosaic_0001>
module attributes {stable_mosaic.version = 11 : i64} {
  func.func @_pool_kernel(%arg0: i32, %arg1: memref<8x256xf32, #tpu.memory_space<vmem>>, %arg2: memref<256x16xf32, #tpu.memory_space<vmem>>, %arg3: memref<8x16xf32, #tpu.memory_space<vmem>>) attributes {dimension_semantics = [#tpu.dimension_semantics<parallel>], iteration_bounds = array<i64: 1>, scalar_prefetch = 0 : i64, scratch_operands = 0 : i64, tpu.core_type = #tpu.core_type<tc>, window_params = [{transform_indices = @transform_0, window_bounds = array<i64: 8, 256>}, {pipeline_mode = #tpu.pipeline_mode<synchronous>, transform_indices = @transform_1, window_bounds = array<i64: 256, 16>}, {transform_indices = @transform_2, window_bounds = array<i64: 8, 16>}]} {
    %c0 = arith.constant 0 : index
    %c0_0 = arith.constant 0 : index
    %0 = vector.load %arg1[%c0, %c0_0] : memref<8x256xf32, #tpu.memory_space<vmem>>, vector<8x256xf32>
    %c0_1 = arith.constant 0 : index
    %c0_2 = arith.constant 0 : index
    %1 = vector.load %arg2[%c0_1, %c0_2] : memref<256x16xf32, #tpu.memory_space<vmem>>, vector<256x16xf32>
    %cst = arith.constant dense<0.000000e+00> : vector<8x16xf32>
    %2 = tpu.matmul %0, %1, %cst {dimension_numbers = #tpu.dot_dimension_numbers<[1], [0], [0], [1], [0, 0, 1, 1], [], []>} : vector<8x256xf32>, vector<256x16xf32>, vector<8x16xf32> -> vector<8x16xf32>
    %c0_3 = arith.constant 0 : index
    %c0_4 = arith.constant 0 : index
    %3 = vector.load %arg3[%c0_3, %c0_4] : memref<8x16xf32, #tpu.memory_space<vmem>>, vector<8x16xf32>
    tpu.vector_store %arg3[%c0_3, %c0_4], %2 {strides = array<i32>} : memref<8x16xf32, #tpu.memory_space<vmem>>, vector<8x16xf32>,
    return
  }
  func.func @transform_0(%arg0: i32) -> (i32, i32) {
    %c0_i32 = arith.constant 0 : i32
    %c0_i32_0 = arith.constant 0 : i32
    return %arg0, %c0_i32 : i32, i32
  }
  func.func @transform_1(%arg0: i32) -> (i32, i32) {
    %c0_i32 = arith.constant 0 : i32
    %c0_i32_0 = arith.constant 0 : i32
    %c0_i32_1 = arith.constant 0 : i32
    return %c0_i32, %c0_i32_0 : i32, i32
  }
  func.func @transform_2(%arg0: i32) -> (i32, i32) {
    %c0_i32 = arith.constant 0 : i32
    %c0_i32_0 = arith.constant 0 : i32
    return %arg0, %c0_i32 : i32, i32
  }
}

</mosaic_0001>

<bundles_post_ra>
// kernel: tpu_custom_call.1
= control target key start
LH: loop header
LB: loop body
LE: loop exit
PB: predicated region body
PF: predicated region fallthrough
CT: control target
= control target key end

     0   :  { %s252_s0 = inlined_call_operand.vmem [shape: f32[8,256], index: 0, kind: input, shape index: {}]   ;;  %s253_s1 = inlined_call_operand.vmem [shape: f32[256,16], index: 1, kind: input, shape index: {}]   ;;  %s254_s2 = inlined_call_operand.hbm [shape: f32[8,16], index: 2, kind: output, shape index: {}]  }
   0x1   :  { %v29_v0 = vld [vmem:[%s253_s1 + $0x78] sm:$0xff]  ;;  %v28_v2 = vld [vmem:[%s253_s1 + $0x70] sm:$0xff]  ;;  %v27_v4 = vld [vmem:[%s253_s1 + $0x68] sm:$0xff] }
   0x2   :  { %v45_v1 = vld [vmem:[%s253_s1 + $0xf8] sm:$0xff]  ;;  %46 = vmatpush.msra.mxu0 %v29_v0  ;;  %v44_v3 = vld [vmem:[%s253_s1 + $0xf0] sm:$0xff]  ;;  %v43_v5 = vld [vmem:[%s253_s1 + $0xe8] sm:$0xff] }
   0x3   :  { %66 = vmatpush.msra.mxu1 %v45_v1  ;;  %v26_v6 = vld [vmem:[%s253_s1 + $0x60] sm:$0xff]  ;;  %v25_v8 = vld [vmem:[%s253_s1 + $0x58] sm:$0xff]  ;;  %v24_v10 = vld [vmem:[%s253_s1 + $0x50] sm:$0xff] }
   0x4   :  { %47 = vmatpush.msra.mxu0 %v28_v2  ;;  %v42_v7 = vld [vmem:[%s253_s1 + $0xe0] sm:$0xff]  ;;  %v41_v9 = vld [vmem:[%s253_s1 + $0xd8] sm:$0xff]  ;;  %v40_v11 = vld [vmem:[%s253_s1 + $0xd0] sm:$0xff] }
   0x5   :  { %67 = vmatpush.msra.mxu1 %v44_v3  ;;  %v23_v12 = vld [vmem:[%s253_s1 + $0x48] sm:$0xff] }
   0x6   :  { %48 = vmatpush.msra.mxu0 %v27_v4  ;;  %v39_v13 = vld [vmem:[%s253_s1 + $0xc8] sm:$0xff] }
   0x7   :  { %68 = vmatpush.msra.mxu1 %v43_v5 }
   0x8   :  { %49 = vmatpush.msra.mxu0 %v26_v6 }
   0x9   :  { %69 = vmatpush.msra.mxu1 %v42_v7 }
   0xa   :  { %50 = vmatpush.msra.mxu0 %v25_v8 }
   0xb   :  { %70 = vmatpush.msra.mxu1 %v41_v9 }
   0xc   :  { %51 = vmatpush.msra.mxu0 %v24_v10 }
   0xd   :  { %71 = vmatpush.msra.mxu1 %v40_v11 }
   0xe   :  { %7 = vsyncpa [#allocation3], 0  ;;  %v22_v14 = vld [vmem:[%s253_s1 + $0x40] sm:$0xff]  ;;  %52 = vmatpush.msra.mxu0 %v23_v12  ;;  %v21_v16 = vld [vmem:[%s253_s1 + $0x38] sm:$0xff]  ;;  %s131_s21 = smov [#allocation2]   ;;  %vm86_vm0 = vcmask 130048  }
   0xf   :  { %v38_v15 = vld [vmem:[%s253_s1 + $0xc0] sm:$0xff]  ;;  %72 = vmatpush.msra.mxu1 %v39_v13  ;;  %v37_v17 = vld [vmem:[%s253_s1 + $0xb8] sm:$0xff]  ;;  %v20_v18 = vld [vmem:[%s253_s1 + $0x30] sm:$0xff]  ;;  %s93_s22 = sshll.u32 %s131_s21, 4  ;;  %s94_s22 = int_to_ptr.vmem [resolvable:$true] %s93_s22 }
  0x10   :  { %53 = vmatpush.msra.mxu0 %v22_v14  ;;  %v36_v19 = vld [vmem:[%s253_s1 + $0xb0] sm:$0xff]  ;;  %v19_v20 = vld [vmem:[%s253_s1 + $0x28] sm:$0xff]  ;;  %v18_v22 = vld [vmem:[%s253_s1 + $0x20] sm:$0xff] }
  0x11   :  { %73 = vmatpush.msra.mxu1 %v38_v15  ;;  %v35_v21 = vld [vmem:[%s253_s1 + $0xa8] sm:$0xff]  ;;  %v34_v23 = vld [vmem:[%s253_s1 + $0xa0] sm:$0xff]  ;;  %v17_v24 = vld [vmem:[%s253_s1 + $0x18] sm:$0xff] }
  0x12   :  { %54 = vmatpush.msra.mxu0 %v21_v16  ;;  %v33_v25 = vld [vmem:[%s253_s1 + $0x98] sm:$0xff]  ;;  %v16_v26 = vld [vmem:[%s253_s1 + $0x10] sm:$0xff]  ;;  %v15_v28 = vld [vmem:[%s253_s1 + $0x8] sm:$0xff] }
  0x13   :  { %74 = vmatpush.msra.mxu1 %v37_v17  ;;  %v32_v27 = vld [vmem:[%s253_s1 + $0x90] sm:$0xff]  ;;  %v31_v29 = vld [vmem:[%s253_s1 + $0x88] sm:$0xff]  ;;  %v14_v30 = vld [vmem:[%s253_s1] sm:$0xff] }
  0x14   :  { %55 = vmatpush.msra.mxu0 %v20_v18  ;;  %v30_v31 = vld [vmem:[%s253_s1 + $0x80] sm:$0xff]  ;;  %v13_v33 = vld [vmem:[%s252_s0 + $0x8] sm:$0xff]  ;;  %s95_s1 = sshll.u32 %s254_s2, 4  ;;  %s96_s1 = int_to_ptr.hbm [resolvable:$true] %s95_s1 }
  0x15   :  { %75 = vmatpush.msra.mxu1 %v36_v19  ;;  %v12_v32 = vld [vmem:[%s252_s0] sm:$0xff] }
  0x16   :  { %56 = vmatpush.msra.mxu0 %v19_v20 }
  0x17   :  { %76 = vmatpush.msra.mxu1 %v35_v21 }
  0x18   :  { %57 = vmatpush.msra.mxu0 %v18_v22 }
  0x19   :  { %77 = vmatpush.msra.mxu1 %v34_v23 }
  0x1a   :  { %58 = vmatpush.msra.mxu0 %v17_v24 }
  0x1b   :  { %78 = vmatpush.msra.mxu1 %v33_v25 }
  0x1c   :  { %59 = vmatpush.msra.mxu0 %v16_v26 }
  0x1d   :  { %79 = vmatpush.msra.mxu1 %v32_v27 }
  0x1e   :  { %60 = vmatpush.msra.mxu0 %v15_v28 }
  0x1f   :  { %80 = vmatpush.msra.mxu1 %v31_v29 }
  0x20   :  { %61 = vmatpush.msra.mxu0 %v14_v30 }
  0x21   :  { %81 = vmatpush.msra.mxu1 %v30_v31  ;;  %62 = vmatmul.f32.vlgmr.msra.gmra.mxu0 %v12_v32 }
  0x22   :  { %82 = vmatmul.f32.vlgmr.msra.gmra.mxu1 %v13_v33 }
  0x9e   :  { %v63_v34 = vpop.f32.mrf.mxu0 }
  0x9f   :  { %v83_v35 = vpop.f32.mrf.mxu1 }
  0xa0   :  { %v84_v36 = vadd.f32 %v83_v35, %v63_v34 }
  0xa2   :  { %87 = vst.msk [vmem:[#allocation2] sm:$0xff] %vm86_vm0, %v84_v36 }
  0xa3   :  { %98 = dma.vmem_to_hbm [thread:$0]  %s94_s22, 128, %s96_s1, [#allocation3]  }
  0xa4   :  { %129 = dma.done.wait [#allocation3], 128  }
  0xa5   :  { %130 = vsyncadd [#allocation3], 4294967168 }
  0xa6   :  { %103 = vsyncpa [#allocation3], 1 }

</bundles_post_ra>
